<compile_context>
chip_gen: v6e
topology: v6e:2x2x1
jax: 0.10.0
libtpu: 0.0.40
codegen_flags: <defaults>
</compile_context>

<pallas_src>
import functools

import jax
import jax.numpy as jnp
import numpy as np
from jax.experimental import pallas as pl
from jax.experimental.pallas import tpu as pltpu


# ----------------------------- fused kernel ----------------------------------
def _sgc_fused_kernel(xt_ref, w1t_ref, b1_ref, w2t_ref, b2_ref, adj_ref,
                      o_ref, zt_ref, *, num_layers):
    # ---- MLP (two GCNLinear layers + ReLU), computed once and cached --------
    @pl.when(pl.program_id(0) == 0)
    def _():
        # hT = relu(W1^T @ x^T + b1)                      (H, N)
        ht = jnp.dot(w1t_ref[...], xt_ref[...],
                     preferred_element_type=jnp.float32)
        ht = jnp.maximum(ht + b1_ref[...], 0.0)           # ReLU
        # dropout: identity (eval mode)
        # zT = W2^T @ hT + b2                             (C, N)
        zt = jnp.dot(w2t_ref[...], ht.astype(w2t_ref.dtype),
                     preferred_element_type=jnp.float32)
        zt_ref[...] = (zt + b2_ref[...]).astype(zt_ref.dtype)

    # ---- dense propagation y = adj @ (adj @ z), in transposed layout --------
    adj = adj_ref[0]                          # (N, N), compute dtype (bf16)
    yt = zt_ref[...].astype(jnp.float32)      # (C, N)
    for _ in range(num_layers):
        # y^T <- y^T @ adj^T : contract adj along its LAST axis so no transpose
        # is materialized (MXU trans_b path); f32 accumulation.
        yt = jax.lax.dot_general(
            yt.astype(adj.dtype), adj,
            dimension_numbers=(((1,), (1,)), ((), ())),
            preferred_element_type=jnp.float32)

    # ---- log_softmax over the class axis (axis 0 of the (C, N) layout) ------
    m = jnp.max(yt, axis=0, keepdims=True)
    s = yt - m
    lse = jnp.log(jnp.sum(jnp.exp(s), axis=0, keepdims=True))
    o_ref[0] = (s - lse).astype(o_ref.dtype)


def _vmem_budget(N, F, H, C, compute_dtype):
    """Explicit scoped-VMEM budget (double-buffered blocks + headroom)."""
    cb = jnp.dtype(compute_dtype).itemsize
    per_step = N * N * cb + C * N * 4                       # adj block + out block
    resident = (F * N + H * F + C * H + C * N) * cb + (H + C) * 4
    need = int(2 * (per_step + resident) * 1.5)             # pipeline + headroom
    return int(min(max(need, 16 << 20), 64 << 20))


# --------------------------------- wrapper -----------------------------------
def sgc_rich_forward(x, adjs, params, num_layers=2, compute_dtype=jnp.bfloat16):
    w1, b1, w2, b2 = params
    N, F = x.shape
    H = w1.shape[1]
    C = w2.shape[1]
    B = adjs.shape[0]
    cdt = compute_dtype

    # Transposed / casted operands so the kernel only needs plain jnp.dot and a
    # lane-dense (C, N) layout. (These are tiny one-time XLA ops; adj should be
    # materialized in bf16 upfront in a real pipeline.)
    xt = x.T.astype(cdt)                        # (F, N)
    w1t = w1.T.astype(cdt)                      # (H, F)
    w2t = w2.T.astype(cdt)                      # (C, H)
    b1c = b1.reshape(H, 1).astype(jnp.float32)  # (H, 1)
    b2c = b2.reshape(C, 1).astype(jnp.float32)  # (C, 1)
    adjs_c = adjs.astype(cdt)                   # (B, N, N)

    kernel = functools.partial(_sgc_fused_kernel, num_layers=num_layers)
    out_t = pl.pallas_call(
        kernel,
        out_shape=jax.ShapeDtypeStruct((B, C, N), jnp.float32),
        grid_spec=pltpu.PrefetchScalarGridSpec(
            num_scalar_prefetch=0,
            grid=(B,),
            in_specs=[
                pl.BlockSpec((F, N), lambda b: (0, 0)),       # x^T   (stays in VMEM)
                pl.BlockSpec((H, F), lambda b: (0, 0)),       # W1^T
                pl.BlockSpec((H, 1), lambda b: (0, 0)),       # b1
                pl.BlockSpec((C, H), lambda b: (0, 0)),       # W2^T
                pl.BlockSpec((C, 1), lambda b: (0, 0)),       # b2
                pl.BlockSpec((1, N, N), lambda b: (b, 0, 0)),  # adjs[b]
            ],
            out_specs=pl.BlockSpec((1, C, N), lambda b: (b, 0, 0)),
            scratch_shapes=[pltpu.VMEM((C, N), cdt)],          # cached z^T
        ),
        compiler_params=pltpu.CompilerParams(
            dimension_semantics=("arbitrary",),   # sequential B: scratch reuse
            vmem_limit_bytes=_vmem_budget(N, F, H, C, cdt),
        ),
    )(xt, w1t, b1c, w2t, b2c, adjs_c)

    # (B, C, N) lane-dense kernel output -> PyTorch layout (B*N, C).
    return jnp.swapaxes(out_t, 1, 2).reshape(B * N, C)


# ------------------------------ params / reference ---------------------------
def init_params(key, in_channels, hidden_channels, out_channels):
    # Matches GCNLinear.reset_parameters: uniform(-stdv, stdv), stdv=1/sqrt(fan_in)
    k1, k2, k3, k4 = jax.random.split(key, 4)
    stdv1 = 1.0 / np.sqrt(in_channels)
    stdv2 = 1.0 / np.sqrt(hidden_channels)
    w1 = jax.random.uniform(k1, (in_channels, hidden_channels), jnp.float32,
                            -stdv1, stdv1)
    b1 = jax.random.uniform(k2, (hidden_channels,), jnp.float32, -stdv1, stdv1)
    w2 = jax.random.uniform(k3, (hidden_channels, out_channels), jnp.float32,
                            -stdv2, stdv2)
    b2 = jax.random.uniform(k4, (out_channels,), jnp.float32, -stdv2, stdv2)
    return w1, b1, w2, b2


def reference_forward(x, adjs, params, num_layers=2, compute_dtype=jnp.bfloat16):
    """Pure-JAX reference mirroring the kernel's precision policy
    (bf16 operands, f32 accumulation)."""
    w1, b1, w2, b2 = params
    cdt = compute_dtype
    h = jnp.dot(x.astype(cdt), w1.astype(cdt),
                preferred_element_type=jnp.float32) + b1
    h = jnp.maximum(h, 0.0)
    z = jnp.dot(h.astype(cdt), w2.astype(cdt),
                preferred_element_type=jnp.float32) + b2
    y = z
    adj_c = adjs.astype(cdt)
    for _ in range(num_layers):
        y = jnp.matmul(adj_c, y.astype(cdt),
                       preferred_element_type=jnp.float32)
    y = y.reshape(-1, y.shape[-1])
    return jax.nn.log_softmax(y, axis=1)


if __name__ == "__main__":
    B, N = 2, 32                  # adjacency batch, nodes per graph
    in_channels, hidden_channels, out_channels = 16, 32, 8
    num_layers = 2

    key = jax.random.PRNGKey(0)
    kx, ka, kp = jax.random.split(key, 3)

    x = jax.random.normal(kx, (N, in_channels), jnp.float32)
    adjs = jax.random.uniform(ka, (B, N, N), jnp.float32)
    adjs = adjs / jnp.sum(adjs, axis=-1, keepdims=True)    # row-normalized

    params = init_params(kp, in_channels, hidden_channels, out_channels)

    out = sgc_rich_forward(x, adjs, params, num_layers=num_layers)
    out = jax.block_until_ready(out)

    ref = reference_forward(x, adjs, params, num_layers=num_layers)
    np.testing.assert_allclose(np.asarray(out), np.asarray(ref),
                               rtol=2e-3, atol=2e-3)
    assert out.shape == (B * N, out_channels)
    print("KERNEL_OK")
</pallas_src>

<mosaic_0001>
module attributes {stable_mosaic.version = 11 : i64} {
  func.func @_sgc_fused_kernel(%arg0: i32, %arg1: memref<16x32xbf16, #tpu.memory_space<vmem>>, %arg2: memref<32x16xbf16, #tpu.memory_space<vmem>>, %arg3: memref<32x1xf32, #tpu.memory_space<vmem>>, %arg4: memref<8x32xbf16, #tpu.memory_space<vmem>>, %arg5: memref<8x1xf32, #tpu.memory_space<vmem>>, %arg6: memref<1x32x32xbf16, #tpu.memory_space<vmem>>, %arg7: memref<1x8x32xf32, #tpu.memory_space<vmem>>, %arg8: memref<8x32xbf16, #tpu.memory_space<vmem>>) attributes {dimension_semantics = [#tpu.dimension_semantics<arbitrary>], iteration_bounds = array<i64: 2>, scalar_prefetch = 0 : i64, scratch_operands = 1 : i64, tpu.core_type = #tpu.core_type<tc>, window_params = [{pipeline_mode = #tpu.pipeline_mode<synchronous>, transform_indices = @transform_0, window_bounds = array<i64: 16, 32>}, {pipeline_mode = #tpu.pipeline_mode<synchronous>, transform_indices = @transform_1, window_bounds = array<i64: 32, 16>}, {pipeline_mode = #tpu.pipeline_mode<synchronous>, transform_indices = @transform_2, window_bounds = array<i64: 32, 1>}, {pipeline_mode = #tpu.pipeline_mode<synchronous>, transform_indices = @transform_3, window_bounds = array<i64: 8, 32>}, {pipeline_mode = #tpu.pipeline_mode<synchronous>, transform_indices = @transform_4, window_bounds = array<i64: 8, 1>}, {transform_indices = @transform_5, window_bounds = array<i64: 1, 32, 32>}, {transform_indices = @transform_6, window_bounds = array<i64: 1, 8, 32>}]} {
    %c0_i32 = arith.constant 0 : i32
    %0 = arith.cmpi eq, %arg0, %c0_i32 : i32
    %1 = arith.extui %0 : i1 to i32
    %c0_i32_0 = arith.constant 0 : i32
    %2 = arith.cmpi ne, %1, %c0_i32_0 : i32
    scf.if %2 {
      %c0_11 = arith.constant 0 : index
      %c0_12 = arith.constant 0 : index
      %24 = vector.load %arg2[%c0_11, %c0_12] : memref<32x16xbf16, #tpu.memory_space<vmem>>, vector<32x16xbf16>
      %c0_13 = arith.constant 0 : index
      %c0_14 = arith.constant 0 : index
      %25 = vector.load %arg1[%c0_13, %c0_14] : memref<16x32xbf16, #tpu.memory_space<vmem>>, vector<16x32xbf16>
      %cst_15 = arith.constant dense<0.000000e+00> : vector<32x32xf32>
      %26 = tpu.matmul %24, %25, %cst_15 {dimension_numbers = #tpu.dot_dimension_numbers<[1], [0], [0], [1], [0, 0, 1, 1], [], []>} : vector<32x16xbf16>, vector<16x32xbf16>, vector<32x32xf32> -> vector<32x32xf32>
      %c0_16 = arith.constant 0 : index
      %c0_17 = arith.constant 0 : index
      %27 = vector.load %arg3[%c0_16, %c0_17] : memref<32x1xf32, #tpu.memory_space<vmem>>, vector<32x1xf32>
      %28 = vector.broadcast %27 : vector<32x1xf32> to vector<32x32xf32>
      %29 = arith.addf %26, %28 : vector<32x32xf32>
      %cst_18 = arith.constant 0.000000e+00 : f32
      %30 = vector.broadcast %cst_18 : f32 to vector<32x32xf32>
      %31 = arith.maximumf %29, %30 : vector<32x32xf32>
      %c0_19 = arith.constant 0 : index
      %c0_20 = arith.constant 0 : index
      %32 = vector.load %arg4[%c0_19, %c0_20] : memref<8x32xbf16, #tpu.memory_space<vmem>>, vector<8x32xbf16>
      %33 = arith.truncf %31 : vector<32x32xf32> to vector<32x32xbf16>
      %cst_21 = arith.constant dense<0.000000e+00> : vector<8x32xf32>
      %34 = tpu.matmul %32, %33, %cst_21 {dimension_numbers = #tpu.dot_dimension_numbers<[1], [0], [0], [1], [0, 0, 1, 1], [], []>} : vector<8x32xbf16>, vector<32x32xbf16>, vector<8x32xf32> -> vector<8x32xf32>
      %c0_22 = arith.constant 0 : index
      %c0_23 = arith.constant 0 : index
      %35 = vector.load %arg5[%c0_22, %c0_23] : memref<8x1xf32, #tpu.memory_space<vmem>>, vector<8x1xf32>
      %36 = vector.broadcast %35 : vector<8x1xf32> to vector<8x32xf32>
      %37 = arith.addf %34, %36 : vector<8x32xf32>
      %38 = arith.truncf %37 : vector<8x32xf32> to vector<8x32xbf16>
      %c0_24 = arith.constant 0 : index
      %c0_25 = arith.constant 0 : index
      %39 = vector.load %arg8[%c0_24, %c0_25] : memref<8x32xbf16, #tpu.memory_space<vmem>>, vector<8x32xbf16>
      tpu.vector_store %arg8[%c0_24, %c0_25], %38 {strides = array<i32>} : memref<8x32xbf16, #tpu.memory_space<vmem>>, vector<8x32xbf16>,
    } else {
    }
    %c0 = arith.constant 0 : index
    %c0_1 = arith.constant 0 : index
    %c0_2 = arith.constant 0 : index
    %3 = vector.load %arg6[%c0, %c0_1, %c0_2] : memref<1x32x32xbf16, #tpu.memory_space<vmem>>, vector<1x32x32xbf16>
    %4 = vector.shape_cast %3 : vector<1x32x32xbf16> to vector<32x32xbf16>
    %c0_3 = arith.constant 0 : index
    %c0_4 = arith.constant 0 : index
    %5 = vector.load %arg8[%c0_3, %c0_4] : memref<8x32xbf16, #tpu.memory_space<vmem>>, vector<8x32xbf16>
    %6 = arith.extf %5 : vector<8x32xbf16> to vector<8x32xf32>
    %7 = arith.truncf %6 : vector<8x32xf32> to vector<8x32xbf16>
    %cst = arith.constant dense<0.000000e+00> : vector<8x32xf32>
    %8 = tpu.matmul %7, %4, %cst {dimension_numbers = #tpu.dot_dimension_numbers<[1], [1], [0], [0], [0, 0, 1, 0], [], []>} : vector<8x32xbf16>, vector<32x32xbf16>, vector<8x32xf32> -> vector<8x32xf32>
    %9 = arith.truncf %8 : vector<8x32xf32> to vector<8x32xbf16>
    %cst_5 = arith.constant dense<0.000000e+00> : vector<8x32xf32>
    %10 = tpu.matmul %9, %4, %cst_5 {dimension_numbers = #tpu.dot_dimension_numbers<[1], [1], [0], [0], [0, 0, 1, 0], [], []>} : vector<8x32xbf16>, vector<32x32xbf16>, vector<8x32xf32> -> vector<8x32xf32>
    %cst_6 = arith.constant dense<0xFF800000> : vector<32xf32>
    %11 = vector.multi_reduction <maximumf>, %10, %cst_6 [0] : vector<8x32xf32> to vector<32xf32>
    %12 = vector.shape_cast %11 : vector<32xf32> to vector<1x32xf32>
    %13 = vector.broadcast %12 : vector<1x32xf32> to vector<8x32xf32>
    %14 = arith.subf %10, %13 : vector<8x32xf32>
    %15 = math.exp %14 : vector<8x32xf32>
    %cst_7 = arith.constant dense<0.000000e+00> : vector<32xf32>
    %16 = vector.multi_reduction <add>, %15, %cst_7 [0] : vector<8x32xf32> to vector<32xf32>
    %17 = vector.shape_cast %16 : vector<32xf32> to vector<1x32xf32>
    %18 = math.log %17 : vector<1x32xf32>
    %19 = vector.broadcast %18 : vector<1x32xf32> to vector<8x32xf32>
    %20 = arith.subf %14, %19 : vector<8x32xf32>
    %c0_8 = arith.constant 0 : index
    %c0_9 = arith.constant 0 : index
    %c0_10 = arith.constant 0 : index
    %21 = vector.load %arg7[%c0_8, %c0_9, %c0_10] : memref<1x8x32xf32, #tpu.memory_space<vmem>>, vector<1x8x32xf32>
    %22 = vector.shape_cast %21 : vector<1x8x32xf32> to vector<8x32xf32>
    %23 = vector.shape_cast %20 : vector<8x32xf32> to vector<1x8x32xf32>
    tpu.vector_store %arg7[%c0_8, %c0_9, %c0_10], %23 {strides = array<i32>} : memref<1x8x32xf32, #tpu.memory_space<vmem>>, vector<1x8x32xf32>,
    return
  }
  func.func @transform_0(%arg0: i32) -> (i32, i32) {
    %c0_i32 = arith.constant 0 : i32
    %c0_i32_0 = arith.constant 0 : i32
    %c0_i32_1 = arith.constant 0 : i32
    return %c0_i32, %c0_i32_0 : i32, i32
  }
  func.func @transform_1(%arg0: i32) -> (i32, i32) {
    %c0_i32 = arith.constant 0 : i32
    %c0_i32_0 = arith.constant 0 : i32
    %c0_i32_1 = arith.constant 0 : i32
    return %c0_i32, %c0_i32_0 : i32, i32
  }
  func.func @transform_2(%arg0: i32) -> (i32, i32) {
    %c0_i32 = arith.constant 0 : i32
    %c0_i32_0 = arith.constant 0 : i32
    %c0_i32_1 = arith.constant 0 : i32
    return %c0_i32, %c0_i32_0 : i32, i32
  }
  func.func @transform_3(%arg0: i32) -> (i32, i32) {
    %c0_i32 = arith.constant 0 : i32
    %c0_i32_0 = arith.constant 0 : i32
    %c0_i32_1 = arith.constant 0 : i32
    return %c0_i32, %c0_i32_0 : i32, i32
  }
  func.func @transform_4(%arg0: i32) -> (i32, i32) {
    %c0_i32 = arith.constant 0 : i32
    %c0_i32_0 = arith.constant 0 : i32
    %c0_i32_1 = arith.constant 0 : i32
    return %c0_i32, %c0_i32_0 : i32, i32
  }
  func.func @transform_5(%arg0: i32) -> (i32, i32, i32) {
    %c0_i32 = arith.constant 0 : i32
    %c0_i32_0 = arith.constant 0 : i32
    %c0_i32_1 = arith.constant 0 : i32
    return %arg0, %c0_i32, %c0_i32_0 : i32, i32, i32
  }
  func.func @transform_6(%arg0: i32) -> (i32, i32, i32) {
    %c0_i32 = arith.constant 0 : i32
    %c0_i32_0 = arith.constant 0 : i32
    %c0_i32_1 = arith.constant 0 : i32
    return %arg0, %c0_i32, %c0_i32_0 : i32, i32, i32
  }
}

</mosaic_0001>

<bundles_post_ra>
// kernel: tpu_custom_call.1
= control target key start
LH: loop header
LB: loop body
LE: loop exit
PB: predicated region body
PF: predicated region fallthrough
CT: control target
= control target key end

     0   :  { %11 = vsyncpa [#allocation4], 0  ;;  %s980_s0 = inlined_call_operand.vmem [shape: bf16[16,32], index: 0, kind: input, shape index: {}]   ;;  %s981_s1 = inlined_call_operand.vmem [shape: bf16[32,16], index: 1, kind: input, shape index: {}]   ;;  %s982_s2 = inlined_call_operand.vmem [shape: f32[32,1], index: 2, kind: input, shape index: {}]   ;;  %s983_s3 = inlined_call_operand.vmem [shape: bf16[8,32], index: 3, kind: input, shape index: {}]   ;;  %s984_s4 = inlined_call_operand.vmem [shape: f32[8,1], index: 4, kind: input, shape index: {}]   ;;  %s985_s5 = inlined_call_operand.vmem [shape: bf16[2,32,32], index: 5, kind: input, shape index: {}]   ;;  %s986_s6 = inlined_call_operand.hbm [shape: f32[2,8,32], index: 6, kind: output, shape index: {}]  }
   0x1   :  { %13 = vsyncpa [#allocation4 + $0x1], 0  ;;  %s843_s21 = smov 0   ;;  %s845_s22 = smov 0  }
   0x2   :  { %s847_s23 = smov 0   ;;  %s849_s24 = smov 0  }
   0x3 LB: > { %s864_s25 = sadd.s32 4294967295, %s800_s24   ;;  %s620_s26 = sadd.s32 4294967294, %s800_s24   ;;  %s800_s24 = sphi %s849_s24, %s992_s24   ;;  %s796_s23 = sphi %s847_s23, %s991_s23   ;;  %s792_s22 = sphi %s845_s22, %s990_s22   ;;  %s788_s21 = sphi %s843_s21, %s989_s21  }
   0x4   : > { %s868_s27 = sadd.s32 1, %s800_s24   ;;  %s157_s28 = sadd.s32 1, %s796_s23 }
   0x5   : > { %s154_s29 = ssub.s32 %s800_s24, %s868_s27  ;;  %p167_p0 = scmp.ne.s32.totalorder %s796_s23, %s792_s22 }
   0x6   : > { %p155_p1 = scmp.eq.s32.totalorder %s154_s29, 0  ;;  %p168_p2 = scmp.eq.s32.totalorder %s864_s25, 1 }
   0x7   : > { %p173_p3 = scmp.ne.s32.totalorder %s792_s22, %s788_s21  ;;  %p174_p4 = scmp.eq.s32.totalorder %s620_s26, 1 }
   0x8   : > { %s879_s30 = scalar_select %p155_p1, %s796_s23, %s157_s28  }
   0x9   : > { %p881_p5 = por %p168_p2, %p167_p0  ;;  %p885_p6 = por %p174_p4, %p173_p3 }
   0xa   : > { %p623_p7 = scmp.ge.s32.totalorder %s800_s24, 1  ;;  %p215_p8 = scmp.lt.s32.totalorder %s800_s24, 3 }
   0xc   : > { %p216_p9 = pnand %p623_p7, %p215_p8 }
   0xd   : > { %s242_s9 = sand.u32 (!%p216_p9), 1, %s792_s22   ;;  %p245_p10 = scmp.lt.s32.totalorder (!%p216_p9), %s864_s25, 1 }
   0xe   : > { %219 = sbr.rel (%p216_p9) target bundleno = 919 (0x397), region = 44  ;;  %s895_s10 = sshll.u32 (!%p216_p9), %s242_s9, 3 }
   0xf   : > { %s244_s16 = scalar_lea.vmem (!%p216_p9), [#allocation3], %s895_s10  ;;  %p627_p11 = scmp.ne.s32.totalorder (!%p216_p9), %s864_s25, 0 }
  0x13   : > { %s246_s11 = scalar_select %p245_p10, %s864_s25, 1 }
  0x14   : > { %254 = sbr.rel (%p627_p11) target bundleno = 439 (0x1b7), region = 48 }
  0x15   : > { %s642_s12 = sshll.u32 %s246_s11, 4 }
  0x16   : > { %s901_s15 = scalar_lea.vmem %s985_s5, %s642_s12 }
  0x19   : > { %v731_v0 = vld [vmem:[%s980_s0] sm:$0xff]   ;;  %vm301_vm0 = vcmask 130048   ;;  %v733_v2 = vld [vmem:[%s981_s1 + $0x8] sm:$0xff]   ;;  %v802_v3 = vmov 0   ;;  %v263_v4 = vld [vmem:[%s982_s2 + $0x10] sm:$0xff]  ;;  %v803_v9 = vmov 0.0  }
  0x1a   : > { %v732_v1 = vld [vmem:[%s981_s1] sm:$0xff]   ;;  %655 = vmatprep.subr.bf16.mxu0 %v731_v0  ;;  %729 = vset.pattern.permute.xlu0 %v802_v3  ;;  %v264_v6 = vld [vmem:[%s982_s2 + $0x18] sm:$0xff]  ;;  %v262_v7 = vld [vmem:[%s982_s2 + $0x8] sm:$0xff]  ;;  %vm804_vm1 = vmmov 0   ;;  %vm370_vm2 = vcmask 261120   ;;  %vm415_vm3 = vcmask 257024  }
  0x1b   : > { %656 = vmatpush3.bf16.msra.mxu0 %v731_v0  ;;  %657 = vmatprep.mubr.msk.bf16.mxu0 %vm301_vm0, %v732_v1  ;;  %v261_v5 = vld [vmem:[%s982_s2] sm:$0xff] }
  0x1c   : > { %277 = vperm.xlu0 %729, %v263_v4   ;;  %730 = vset.pattern.permute.xlu1 %v802_v3  ;;  %v364_v8 = vld [vmem:[%s984_s4] sm:$0xff] }
  0x1d   : > { %267 = vperm.xlu1 %730, %v261_v5   ;;  %661 = vmatprep.subr.bf16.mxu1 %v803_v9  ;;  %v361_v28 = vld [vmem:[%s983_s3] sm:$0xf] }
  0x1e   : > { %658 = vmatmul.mubr.msk.bf16.vlgmr.msra.gmra.mxu0 %vm301_vm0, %v733_v2  ;;  %665 = vmatprep.mubr.msk.bf16.mxu1 %vm804_vm1, %v803_v9 }
  0x20   : > { %282 = vperm.xlu0 %729, %v264_v6  }
  0x21   : > { %272 = vperm.xlu1 %730, %v262_v7  }
  0x24   : > { %367 = vperm.xlu0 %729, %v364_v8  }
  0x97   : > { %v278_v10 = vpop.permute.xlu0 %277 }
  0x98   : > { %v268_v11 = vpop.permute.xlu1 %267 }
  0x9b   : > { %v283_v15 = vpop.permute.xlu0 %282 }
  0x9c   : > { %v273_v18 = vpop.permute.xlu1 %272 }
  0x9f   : > { %v368_v29 = vpop.permute.xlu0 %367 }
  0xde   : > { %v659_v12 = vpop.f32.mrf.mxu0 }
  0xdf   : > { %v351_v14 = vadd.f32 %v659_v12, %v278_v10 }
  0xe0   : > { %v342_v13 = vpop.f32.mrf.mxu0 }
  0xe1   : > { %v359_v20 = vmax.f32 %v351_v14, 0.0  ;;  %v343_v21 = vadd.f32 %v342_v13, %v268_v11 }
  0xe2   : > { %v660_v16 = vpop.f32.mrf.mxu0 }
  0xe3   : > { %v354_v17 = vadd.f32 %v660_v16, %v283_v15  ;;  %v357_v26 = vmax.f32 %v343_v21, 0.0 }
  0xe4   : > { %v345_v19 = vpop.f32.mrf.mxu0 }
  0xe5   : > { %v360_v22 = vmax.f32 %v354_v17, 0.0  ;;  %v346_v23 = vadd.f32 %v345_v19, %v273_v18 }
  0xe7   : > { %v358_v24 = vmax.f32 %v346_v23, 0.0  ;;  %v363_v25 = vpack.c.bf16 %v360_v22, %v359_v20 }
  0xe9   : > { %662 = vmatpush3.bf16.msra.mxu1 %v363_v25  ;;  %v362_v27 = vpack.c.bf16 %v358_v24, %v357_v26 }
  0xea   : > { %663 = vmatprep.subr.bf16.mxu1 %v803_v9 }
  0xed   : > { %664 = vmatpush3.bf16.msra.mxu1 %v362_v27 }
  0xf0   : > { %666 = vmatmul.mubr.msk.bf16.vlgmr.msra.gmra.mxu1 %vm370_vm2, %v361_v28 }
 0x1b0   : > { %v408_v30 = vpop.f32.mrf.mxu1 }
 0x1b1   : > { %v409_v31 = vadd.f32 %v408_v30, %v368_v29 }
 0x1b2   : > { %v667_v32 = vpop.f32.mrf.mxu1 }
 0x1b3   : > { %v414_v33 = vpack.c.bf16 %v409_v31, %v409_v31 }
 0x1b4   : > { %v411_v34 = vpop.f32.mrf.mxu1 }
 0x1b5   : > { %416 = vst.msk [vmem:[#allocation2] sm:$0xf] %vm415_vm3, %v414_v33 }
 0x1b6   : > { %v668_v35 = vpop.f32.mrf.mxu1 }
 0x1b7 PF: > { %v734_v36 = vld [vmem:[%s901_s15 + $0x8] sm:$0xff]   ;;  %v805_v37 = vmov 0.0   ;;  %vm432_vm4 = vcmask 261120   ;;  %vm806_vm5 = vmmov 0   ;;  %v735_v39 = vld [vmem:[%s901_s15] sm:$0xff]   ;;  %s639_s15 = sshll.u32 %s864_s25, 7 }
 0x1b8   : > { %669 = vmatprep.subr.bf16.mxu0 %v805_v37  ;;  %677 = vmatprep.subr.bf16.mxu1 %v805_v37  ;;  %v440_v38 = vsel %vm432_vm4, %v734_v36, 0  ;;  %v437_v40 = vsel %vm432_vm4, %v735_v39, 0  ;;  %s561_s11 = sshll.u32 %s244_s16, 4  ;;  %s559_s14 = scalar_lea.hbm %s986_s6, %s639_s15  ;;  %s562_s11 = int_to_ptr.vmem [resolvable:$true] %s561_s11 }
 0x1b9   : > { %670 = vmatpush3.bf16.xpose.msra.mxu0 %v440_v38  ;;  %673 = vmatprep.mubr.msk.bf16.mxu0 %vm806_vm5, %v805_v37  ;;  %s548_s17 = scalar_lea.sflag [#allocation4], %s242_s9  ;;  %s740_s18 = scalar_lea.vmem %s562_s11, 128 }
 0x1ba   : > { %671 = vmatprep.subr.bf16.mxu0 %v805_v37  ;;  %678 = vmatpush3.bf16.xpose.msra.mxu1 %v440_v38  ;;  %p741_p12 = scmp.ne.s32.totalorder %s562_s11, %s740_s18  ;;  %s807_s25 = smov [#allocation3]  }
 0x1bb   : > { %679 = vmatprep.subr.bf16.mxu1 %v805_v37  ;;  %681 = vmatprep.mubr.msk.bf16.mxu1 %vm806_vm5, %v805_v37  ;;  %s744_s19 = sshll.u32 %s807_s25, 4  ;;  %s745_s19 = int_to_ptr.vmem [resolvable:$false] %s744_s19 }
 0x1bc   : > { %v421_v41 = vld [vmem:[#allocation2] sm:$0xf]  ;;  %p742_p13 = pnand %p741_p12, %p881_p5  ;;  %s746_s20 = scalar_lea.vmem %s745_s19, 256 }
 0x1bd   : > { %p747_p1 = scmp.lt.s32.totalorder %s562_s11, %s745_s19  ;;  %p748_p2 = scmp.lt.s32.totalorder %s746_s20, %s740_s18 }
 0x1be   : > { %p743_p0 = pneg %p742_p13 }
 0x1bf   : > { %p749_p3 = por %p748_p2, %p747_p1 }
 0x1c1   : > { %672 = vmatpush3.bf16.xpose.msra.mxu0 %v437_v40  ;;  %p750_p4 = pnand %p749_p3, %p743_p0 }
 0x1c2   : > { %680 = vmatpush3.bf16.xpose.msra.mxu1 %v437_v40 }
 0x1c8   : > { %674 = vmatmul.mubr.msk.bf16.vlgmr.msra.gmra.mxu0 %vm432_vm4, %v421_v41 }
 0x288   : > { %v476_v42 = vpop.f32.mrf.mxu0 }
 0x289   : > { %v482_v43 = vpack.c.bf16 %v476_v42, %v476_v42 }
 0x28a   : > { %v675_v44 = vpop.f32.mrf.mxu0 }
 0x28b   : > { %682 = vmatmul.mubr.msk.bf16.vlgmr.msra.gmra.mxu1 %vm432_vm4, %v482_v43 }
 0x28c   : > { %v479_v45 = vpop.f32.mrf.mxu0 }
 0x28e   : > { %v676_v46 = vpop.f32.mrf.mxu0 }
 0x34b   : > { %v520_v47 = vpop.f32.mrf.mxu1 }
 0x34c   : > { %v526_v48 = vsel %vm432_vm4, %v520_v47, -inf }
 0x34d   : > { %v527_v49 = vrot.slane %v526_v48, 4  ;;  %v683_v50 = vpop.f32.mrf.mxu1 }
 0x34f   : > { %v528_v51 = vmax.f32 %v526_v48, %v527_v49  ;;  %v523_v52 = vpop.f32.mrf.mxu1 }
 0x351   : > { %v529_v53 = vrot.slane %v528_v51, 2  ;;  %v684_v54 = vpop.f32.mrf.mxu1 }
 0x353   : > { %v530_v55 = vmax.f32 %v528_v51, %v529_v53 }
 0x355   : > { %v531_v56 = vrot.slane %v530_v55, 1 }
 0x357   : > { %v532_v57 = vmax.f32 %v530_v55, %v531_v56 }
 0x359   : > { %v533_v58 = vsub.f32 %v520_v47, %v532_v57 }
 0x35b   : > { %v534_v59 = vmul.f32 1.442695, %v533_v58 }
 0x35d   : > { %736 = vpow2.f32 %v534_v59 }
 0x36a   : > { %v737_v60 = vpop.eup %736 }
 0x36b   : > { %v536_v61 = vsel %vm432_vm4, %v737_v60, 0.0 }
 0x36c   : > { %v537_v62 = vrot.slane %v536_v61, 4 }
 0x36e   : > { %v538_v63 = vadd.f32 %v537_v62, %v536_v61 }
 0x370   : > { %v539_v0 = vrot.slane %v538_v63, 2 }
 0x372   : > { %v540_v1 = vadd.f32 %v539_v0, %v538_v63 }
 0x374   : > { %v541_v2 = vrot.slane %v540_v1, 1 }
 0x376   : > { %v542_v3 = vadd.f32 %v541_v2, %v540_v1 }
 0x378   : > { %738 = vlog2.f32 %v542_v3 }
 0x385   : > { %v739_v4 = vpop.eup %738 }
 0x386   : > { %v544_v5 = vmul.f32 0.6931472, %v739_v4 }
 0x388   : > { %v545_v6 = vsub.f32 %v533_v58, %v544_v5 }
 0x38a   : > { %546 = vst.msk [vmem:[%s244_s16] sm:$0xff] %vm432_vm4, %v545_v6 }
 0x38b   : > { %753 = shalt.err (!%p750_p4)
}
 0x38c   : > { %s754_s26 = scalar_lea.hbm %s559_s14, 128  ;;  %s758_s16 = scalar_lea.hbm %s986_s6, 256 }
 0x38d   : > { %p755_p7 = scmp.ne.s32.totalorder %s559_s14, %s754_s26  ;;  %p759_p10 = scmp.lt.s32.totalorder %s559_s14, %s986_s6 }
 0x38e   : > { %p760_p11 = scmp.lt.s32.totalorder %s758_s16, %s754_s26 }
 0x38f   : > { %p756_p8 = pnand %p755_p7, %p881_p5 }
 0x390   : > { %p761_p12 = por %p760_p11, %p759_p10 }
 0x391   : > { %p757_p9 = pneg %p756_p8 }
 0x393   : > { %p762_p13 = pnand %p761_p12, %p757_p9 }
 0x395   : > { %765 = shalt.err (!%p762_p13)
}
 0x396   : > { %685 = dma.vmem_to_hbm [thread:$0]  (%p881_p5), %s562_s11, 128, %s559_s14, %s548_s17  }
 0x397 PF: > { %p691_p0 = scmp.ge.s32.totalorder %s800_s24, 2  ;;  %s573_s15 = sand.u32 1, %s788_s21  }
 0x398   : > { %s574_s12 = scalar_lea.sflag [#allocation4], %s573_s15 }
 0x399   : > { %p688_p1 = pnand %p691_p0, %p885_p6 }
 0x39b   : > { %p689_p2 = pneg %p688_p1 }
 0x39d   : > { %783 = dma.done.wait (%p689_p2), %s574_s12, 128  }
 0x39e   : > { %785 = vsyncadd (%p689_p2), %s574_s12, 4294967168  ;;  %p16_p3 = scmp.ge.s32.totalorder %s868_s27, 4   ;;  %s989_s21 = smov %s792_s22 }
 0x39f   : > { %s990_s22 = smov %s796_s23  ;;  %s991_s23 = smov %s879_s30 }
 0x3a0   : > { %s992_s24 = smov %s868_s27  ;;  %18 = sbr.rel (!%p16_p3) target bundleno = 3 (0x3), region = 83 }
 0x3a5   :  { %579 = vsyncpa [#allocation4], 1 }
 0x3a6   :  { %581 = vsyncpa [#allocation4 + $0x1], 1 }

</bundles_post_ra>
